<compile_context>
chip_gen: v7x
topology: tpu7x:2x2x1
jax: 0.10.0
libtpu: 0.0.40
codegen_flags: <defaults>
</compile_context>

<pallas_src>
import functools

import jax
import jax.numpy as jnp
from jax import lax
from jax.experimental import pallas as pl
from jax.experimental.pallas import tpu as pltpu


def _is_v7x():
    """Detect v7x so the MXU lane-reduce offload is only enabled there."""
    try:
        kind = jax.devices()[0].device_kind.lower()
    except Exception:
        return False
    return any(tag in kind for tag in ("v7", "7x", "tpu7"))


def _focal_loss_kernel(*refs, alpha_scalar, gamma, reduction, n, tile_n,
                       use_alpha_vec, mxu_reduce):
    if use_alpha_vec:
        pred_ref, target_ref, alpha_ref, out_ref = refs
    else:
        pred_ref, target_ref, out_ref = refs

    logits = pred_ref[...].astype(jnp.float32)            # (tile_n, C)
    tgt = target_ref[...]                                  # (tile_n, 1) int32

    # Numerically stable log-softmax pieces along the class (lane) axis,
    # without materializing the full log_softmax matrix.
    m = jnp.max(logits, axis=1, keepdims=True)             # row max (XLU)
    shifted = logits - m                                    # (tile_n, C)

    # One-hot mask for the target gather (no dynamic gather on TPU).
    col = lax.broadcasted_iota(jnp.int32, logits.shape, 1)
    onehot = col == tgt                                     # (tile_n, C)

    if mxu_reduce:
        # v7x: offload the two full-lane reductions to the idle MXU via a
        # dot with a ones column.  HIGHEST precision keeps f32 accuracy
        # (extra MXU passes are free - the MXU is otherwise unused here).
        ones_col = jnp.ones((logits.shape[1], 1), jnp.float32)
        sumexp = jnp.dot(jnp.exp(shifted), ones_col,
                         precision=lax.Precision.HIGHEST,
                         preferred_element_type=jnp.float32)
        tgt_shift = jnp.dot(jnp.where(onehot, shifted, 0.0), ones_col,
                            precision=lax.Precision.HIGHEST,
                            preferred_element_type=jnp.float32)
    else:
        # v5e / v6e: plain XLU lane reductions (memory-bound anyway).
        sumexp = jnp.sum(jnp.exp(shifted), axis=1, keepdims=True)
        tgt_shift = jnp.sum(jnp.where(onehot, shifted, 0.0),
                            axis=1, keepdims=True)

    logpt = tgt_shift - jnp.log(sumexp)                     # (tile_n, 1), <= 0
    ce_loss = -logpt
    pt = jnp.exp(logpt)
    one_minus_pt = 1.0 - pt

    g = float(gamma)
    if g.is_integer() and 0 <= g <= 8:
        # Integer gamma: repeated multiply on the VPU (no pow -> log/exp).
        w = jnp.ones_like(one_minus_pt)
        for _ in range(int(g)):
            w = w * one_minus_pt
    else:
        # General gamma: clamp tiny negative rounding noise before pow.
        # (Benign deviation: PyTorch would emit NaN if pt rounds above 1.)
        w = jnp.maximum(one_minus_pt, 0.0) ** jnp.float32(g)

    focal = w * ce_loss                                     # (tile_n, 1)

    if use_alpha_vec:
        # Per-class alpha: one extra lane reduce (tiny; kept on the XLU).
        alpha_t = jnp.sum(jnp.where(onehot, alpha_ref[...], 0.0),
                          axis=1, keepdims=True)
        focal = alpha_t * focal
    elif alpha_scalar != 1.0:
        focal = focal * jnp.float32(alpha_scalar)

    if reduction in ('mean', 'sum'):
        # Clipped edge block: the rows past n hold undefined data.  Use a
        # select-based mask (safe against Inf/NaN garbage) before reducing.
        if n % tile_n != 0:
            rows = (lax.broadcasted_iota(jnp.int32, focal.shape, 0)
                    + pl.program_id(0) * tile_n)
            focal = jnp.where(rows < n, focal, 0.0)
        # Resident (1,1) accumulator block (index_map is constant), written
        # back to HBM once after the last grid step.
        @pl.when(pl.program_id(0) == 0)
        def _():
            out_ref[...] = jnp.zeros_like(out_ref)
        out_ref[...] = out_ref[...] + jnp.sum(focal)
    else:  # 'none'
        # Edge-block rows past n are dropped by the clipped output DMA.
        # NOTE: lane-width-1 stores are masked vst; output bytes are << input
        # bytes here, so the lane-dense transpose trick is not worth the XLU.
        out_ref[...] = focal


def focal_loss(pred, target, alpha=1.0, gamma=2.0, reduction='mean',
               tile_n=None, mxu_reduce=None):
    """Pallas TPU implementation of FocalLoss.forward.

    pred:   (N, C) float logits (any float dtype; upcast to f32 in-kernel)
    target: (N,)   int class indices
    alpha:  python scalar (common case) or per-class array of length C
    """
    n, c = pred.shape
    itemsize = jnp.dtype(pred.dtype).itemsize
    sub = max(8, 32 // max(itemsize, 1))      # sublane granularity per dtype
    use_alpha_vec = not isinstance(alpha, (int, float))

    if mxu_reduce is None:
        mxu_reduce = _is_v7x()

    # Row tile size: ~4 MiB per (double-buffered) pred buffer, capped at 4096
    # rows so the narrow (tile_n, 1) f32 temporaries (tile_n/8 vregs each)
    # keep the in-kernel working set well under the VMEM limit on every
    # generation, including v7x's 64 MiB.
    ceil_sub_n = ((n + sub - 1) // sub) * sub
    if tile_n is None:
        bytes_per_row = max(c * itemsize, 1)
        tile_n = min(4096, (4 * 1024 * 1024) // bytes_per_row)
    tile_n = max(sub, (int(tile_n) // sub) * sub)
    tile_n = min(tile_n, ceil_sub_n)
    if tile_n >= n:
        tile_n = n          # single block == full array dims (always legal)
    num_tiles = -(-n // tile_n)                # cdiv; edge block is clipped

    # No padding of pred: block last dim == full C (legal by the full-dim
    # exception), edge rows handled in-kernel / by clipped DMAs.
    tgt2d = target.astype(jnp.int32).reshape(n, 1)

    in_specs = [
        pl.BlockSpec((tile_n, c), lambda i: (i, 0)),   # pred tile (input dtype)
        pl.BlockSpec((tile_n, 1), lambda i: (i, 0)),   # target tile
    ]
    args = [pred, tgt2d]

    if use_alpha_vec:
        alpha_vec = jnp.asarray(alpha, jnp.float32).reshape(1, c)
        in_specs.append(pl.BlockSpec((1, c), lambda i: (0, 0)))
        args.append(alpha_vec)

    if reduction in ('mean', 'sum'):
        # Single resident accumulator block; grid axis must be 'arbitrary'.
        out_shape = jax.ShapeDtypeStruct((1, 1), jnp.float32)
        out_spec = pl.BlockSpec((1, 1), lambda i: (0, 0))
        dims = ("arbitrary",)
    else:
        out_shape = jax.ShapeDtypeStruct((n, 1), jnp.float32)
        out_spec = pl.BlockSpec((tile_n, 1), lambda i: (i, 0))
        # Independent tiles; 'parallel' is megacore-safe.  On v7x, switching
        # to pltpu.CORE_PARALLEL is the follow-up once verified on hardware.
        dims = ("parallel",)

    kernel = functools.partial(
        _focal_loss_kernel,
        alpha_scalar=(None if use_alpha_vec else float(alpha)),
        gamma=float(gamma), reduction=reduction, n=n, tile_n=tile_n,
        use_alpha_vec=use_alpha_vec, mxu_reduce=bool(mxu_reduce))

    out = pl.pallas_call(
        kernel,
        out_shape=out_shape,
        grid=(num_tiles,),
        in_specs=in_specs,
        out_specs=out_spec,
        compiler_params=pltpu.CompilerParams(
            dimension_semantics=dims,
            # Big-tile double buffering + f32 working set; 48 MiB is above the
            # 16/32 MiB scoped defaults and below v7x's 64 MiB physical VMEM.
            vmem_limit_bytes=48 * 1024 * 1024),
    )(*args)

    if reduction == 'mean':
        return out[0, 0] / jnp.float32(n)
    if reduction == 'sum':
        return out[0, 0]
    return out[:, 0]


def _focal_loss_ref(pred, target, alpha=1.0, gamma=2.0, reduction='mean'):
    """Pure-JAX reference (mirrors the PyTorch forward)."""
    log_softmax = jax.nn.log_softmax(pred.astype(jnp.float32), axis=1)
    logpt = jnp.take_along_axis(
        log_softmax, target.reshape(-1, 1).astype(jnp.int32), axis=1)[:, 0]
    ce = -logpt
    pt = jnp.exp(logpt)
    if isinstance(alpha, (int, float)):
        alpha_t = jnp.full_like(pt, alpha)
    else:
        alpha_t = jnp.asarray(alpha, jnp.float32)[target]
    fl = alpha_t * (1.0 - pt) ** gamma * ce
    if reduction == 'mean':
        return jnp.mean(fl)
    elif reduction == 'sum':
        return jnp.sum(fl)
    return fl


if __name__ == "__main__":
    key = jax.random.PRNGKey(0)
    k1, k2, k3, k4, k5, k6 = jax.random.split(key, 6)

    # Case 1: small batch, C < 128 (unpadded lanes), scalar alpha, mean.
    N, C = 8, 16
    pred = jax.random.normal(k1, (N, C), dtype=jnp.float32)
    target = jax.random.randint(k2, (N,), 0, C, dtype=jnp.int32)
    out = jax.block_until_ready(
        focal_loss(pred, target, alpha=1.0, gamma=2.0, reduction='mean'))
    ref = _focal_loss_ref(pred, target, 1.0, 2.0, 'mean')
    assert jnp.allclose(out, ref, rtol=1e-5, atol=1e-6), (out, ref)

    # Case 2: multi-tile grid with a clipped edge block (N % tile_n != 0),
    # scalar alpha != 1, sum reduction (in-kernel accumulator path).
    N2, C2 = 50, 40
    pred2 = jax.random.normal(k3, (N2, C2), dtype=jnp.float32)
    target2 = jax.random.randint(k4, (N2,), 0, C2, dtype=jnp.int32)
    out2 = jax.block_until_ready(
        focal_loss(pred2, target2, alpha=0.25, gamma=2.0, reduction='sum',
                   tile_n=16))
    ref2 = _focal_loss_ref(pred2, target2, 0.25, 2.0, 'sum')
    assert jnp.allclose(out2, ref2, rtol=1e-5, atol=1e-5), (out2, ref2)

    # Case 3: C >= 128, per-class alpha, non-integer gamma, reduction='none'
    # with a clipped edge block whose OOB output rows are dropped.
    N3, C3 = 20, 160
    pred3 = jax.random.normal(k5, (N3, C3), dtype=jnp.float32)
    target3 = jax.random.randint(k6, (N3,), 0, C3, dtype=jnp.int32)
    alpha_vec = jnp.linspace(0.5, 1.5, C3, dtype=jnp.float32)
    out3 = jax.block_until_ready(
        focal_loss(pred3, target3, alpha=alpha_vec, gamma=1.5,
                   reduction='none', tile_n=8))
    ref3 = _focal_loss_ref(pred3, target3, alpha_vec, 1.5, 'none')
    assert jnp.allclose(out3, ref3, rtol=2e-5, atol=1e-5), (out3, ref3)

    print("KERNEL_OK")
</pallas_src>

<mosaic_0001>
module attributes {stable_mosaic.version = 11 : i64} {
  func.func @_focal_loss_kernel(%arg0: i32, %arg1: memref<8x16xf32, #tpu.memory_space<vmem>>, %arg2: memref<8x1xi32, #tpu.memory_space<vmem>>, %arg3: memref<1x1xf32, #tpu.memory_space<vmem>>) attributes {dimension_semantics = [#tpu.dimension_semantics<arbitrary>], iteration_bounds = array<i64: 1>, scalar_prefetch = 0 : i64, scratch_operands = 0 : i64, tpu.core_type = #tpu.core_type<tc>, window_params = [{transform_indices = @transform_0, window_bounds = array<i64: 8, 16>}, {transform_indices = @transform_1, window_bounds = array<i64: 8, 1>}, {pipeline_mode = #tpu.pipeline_mode<synchronous>, transform_indices = @transform_2, window_bounds = array<i64: 1, 1>}]} {
    %c0 = arith.constant 0 : index
    %c0_0 = arith.constant 0 : index
    %0 = vector.load %arg1[%c0, %c0_0] : memref<8x16xf32, #tpu.memory_space<vmem>>, vector<8x16xf32>
    %c0_1 = arith.constant 0 : index
    %c0_2 = arith.constant 0 : index
    %1 = vector.load %arg2[%c0_1, %c0_2] : memref<8x1xi32, #tpu.memory_space<vmem>>, vector<8x1xi32>
    %cst = arith.constant dense<0xFF800000> : vector<8xf32>
    %2 = vector.multi_reduction <maximumf>, %0, %cst [1] : vector<8x16xf32> to vector<8xf32>
    %3 = vector.shape_cast %2 : vector<8xf32> to vector<8x1xf32>
    %4 = vector.broadcast %3 : vector<8x1xf32> to vector<8x16xf32>
    %5 = arith.subf %0, %4 : vector<8x16xf32>
    %6 = tpu.iota {dimensions = array<i32: 1>} : vector<8x16xi32>
    %7 = vector.broadcast %1 : vector<8x1xi32> to vector<8x16xi32>
    %8 = arith.cmpi eq, %6, %7 : vector<8x16xi32>
    %9 = math.exp %5 : vector<8x16xf32>
    %cst_3 = arith.constant dense<0.000000e+00> : vector<8xf32>
    %10 = vector.multi_reduction <add>, %9, %cst_3 [1] : vector<8x16xf32> to vector<8xf32>
    %11 = vector.shape_cast %10 : vector<8xf32> to vector<8x1xf32>
    %cst_4 = arith.constant 0.000000e+00 : f32
    %12 = vector.broadcast %cst_4 : f32 to vector<8x16xf32>
    %13 = arith.select %8, %5, %12 : vector<8x16xi1>, vector<8x16xf32>
    %cst_5 = arith.constant dense<0.000000e+00> : vector<8xf32>
    %14 = vector.multi_reduction <add>, %13, %cst_5 [1] : vector<8x16xf32> to vector<8xf32>
    %15 = vector.shape_cast %14 : vector<8xf32> to vector<8x1xf32>
    %16 = math.log %11 : vector<8x1xf32>
    %17 = arith.subf %15, %16 : vector<8x1xf32>
    %cst_6 = arith.constant 0.000000e+00 : f32
    %18 = vector.broadcast %cst_6 : f32 to vector<8x1xf32>
    %19 = arith.subf %18, %17 : vector<8x1xf32>
    %20 = math.exp %17 : vector<8x1xf32>
    %cst_7 = arith.constant 1.000000e+00 : f32
    %21 = vector.broadcast %cst_7 : f32 to vector<8x1xf32>
    %22 = arith.subf %21, %20 : vector<8x1xf32>
    %cst_8 = arith.constant 1.000000e+00 : f32
    %23 = vector.broadcast %cst_8 : f32 to vector<8x1xf32>
    %24 = arith.mulf %23, %22 : vector<8x1xf32>
    %25 = arith.mulf %24, %22 : vector<8x1xf32>
    %26 = arith.mulf %25, %19 : vector<8x1xf32>
    %c0_i32 = arith.constant 0 : i32
    %27 = arith.cmpi eq, %arg0, %c0_i32 : i32
    %28 = arith.extui %27 : i1 to i32
    %c0_i32_9 = arith.constant 0 : i32
    %29 = arith.cmpi ne, %28, %c0_i32_9 : i32
    scf.if %29 {
      %cst_15 = arith.constant 0.000000e+00 : f32
      %38 = vector.broadcast %cst_15 : f32 to vector<1x1xf32>
      %c0_16 = arith.constant 0 : index
      %c0_17 = arith.constant 0 : index
      %39 = vector.load %arg3[%c0_16, %c0_17] : memref<1x1xf32, #tpu.memory_space<vmem>>, vector<1x1xf32>
      tpu.vector_store %arg3[%c0_16, %c0_17], %38 {strides = array<i32>} : memref<1x1xf32, #tpu.memory_space<vmem>>, vector<1x1xf32>,
    } else {
    }
    %c0_10 = arith.constant 0 : index
    %c0_11 = arith.constant 0 : index
    %30 = vector.load %arg3[%c0_10, %c0_11] : memref<1x1xf32, #tpu.memory_space<vmem>>, vector<1x1xf32>
    %31 = vector.shape_cast %26 : vector<8x1xf32> to vector<1x8x1xf32>
    %cst_12 = arith.constant dense<0.000000e+00> : vector<1xf32>
    %32 = vector.multi_reduction <add>, %31, %cst_12 [1, 2] : vector<1x8x1xf32> to vector<1xf32>
    %33 = vector.shape_cast %32 : vector<1xf32> to vector<1x1x1xf32>
    %34 = vector.extract %33[0, 0, 0] : f32 from vector<1x1x1xf32>
    %35 = vector.broadcast %34 : f32 to vector<1x1xf32>
    %36 = arith.addf %30, %35 : vector<1x1xf32>
    %c0_13 = arith.constant 0 : index
    %c0_14 = arith.constant 0 : index
    %37 = vector.load %arg3[%c0_13, %c0_14] : memref<1x1xf32, #tpu.memory_space<vmem>>, vector<1x1xf32>
    tpu.vector_store %arg3[%c0_13, %c0_14], %36 {strides = array<i32>} : memref<1x1xf32, #tpu.memory_space<vmem>>, vector<1x1xf32>,
    return
  }
  func.func @transform_0(%arg0: i32) -> (i32, i32) {
    %c0_i32 = arith.constant 0 : i32
    %c0_i32_0 = arith.constant 0 : i32
    return %arg0, %c0_i32 : i32, i32
  }
  func.func @transform_1(%arg0: i32) -> (i32, i32) {
    %c0_i32 = arith.constant 0 : i32
    %c0_i32_0 = arith.constant 0 : i32
    return %arg0, %c0_i32 : i32, i32
  }
  func.func @transform_2(%arg0: i32) -> (i32, i32) {
    %c0_i32 = arith.constant 0 : i32
    %c0_i32_0 = arith.constant 0 : i32
    %c0_i32_1 = arith.constant 0 : i32
    return %c0_i32, %c0_i32_0 : i32, i32
  }
}

</mosaic_0001>

<bundles_post_ra>
// kernel: tpu_custom_call.1
= control target key start
LH: loop header
LB: loop body
LE: loop exit
PB: predicated region body
PF: predicated region fallthrough
CT: control target
= control target key end

     0   :  { %vm14_vm0 = vcmask 130048   ;;  %s156_s0 = inlined_call_operand.vmem [shape: f32[8,16], index: 0, kind: input, shape index: {}]   ;;  %s157_s1 = inlined_call_operand.vmem [shape: s32[8,1], index: 1, kind: input, shape index: {}]   ;;  %s158_s2 = inlined_call_operand.hbm [shape: f32[1,1], index: 2, kind: output, shape index: {}]  }
   0x1   :  { %v12_v0 = vld [vmem:[%s156_s0] sm:$0xff] }
   0x2   :  { %7 = vsyncpa [#allocation3], 0  ;;  %v15_v1 = vsel %vm14_vm0, %v12_v0, -inf  ;;  %v115_v2 = vmov 0   ;;  %v13_v3 = vld [vmem:[%s157_s1] sm:$0xff]  ;;  %v19_v7 = vlaneseq  ;;  %vm50_vm2 = vcmask 7168  }
   0x3   :  { %84 = vset.pattern.permute.xlu0 %v115_v2  ;;  %vm47_vm3 = vcmask 0   ;;  %v116_v26 = vmov 0.0   ;;  %s117_s0 = smov [#allocation2]  }
   0x4   :  { %16 = vmax.xlane.f32.xlu0 %v15_v1  ;;  %v20_v8 = vand.u32 127, %v19_v7  ;;  %48 = vst.msk [vmem:[#allocation2] sm:$0x1] %vm47_vm3, %v116_v26  ;;  %s71_s1 = sshll.u32 %s117_s0, 4  ;;  %s72_s1 = int_to_ptr.vmem [resolvable:$true] %s71_s1 }
   0x5   :  { %s91_s14 = scalar_lea.vmem %s72_s1, 16  ;;  %s95_s15 = scalar_lea.vmem %s72_s1, 32 }
   0x6   :  { %p92_p0 = scmp.ne.s32.totalorder %s72_s1, %s91_s14  ;;  %p96_p1 = scmp.lt.s32.totalorder %s72_s1, %s72_s1 }
   0x7   :  { %p97_p2 = scmp.lt.s32.totalorder %s95_s15, %s91_s14 }
   0x9   :  { %p98_p3 = por %p97_p2, %p96_p1 }
   0xb   :  { %v49_v34 = vld [vmem:[#allocation2] sm:$0x1]  ;;  %p99_p4 = pnand %p98_p3, %p92_p0 }
  0x1a   :  { %22 = vperm.xlu0 %84, %v13_v3  }
  0x91   :  { %v17_v4 = vpop.xlane.xlu0 %16 }
  0x92   :  { %v18_v5 = vsub.f32 %v12_v0, %v17_v4 }
  0x94   :  { %v25_v6 = vmul.f32 1.442695, %v18_v5 }
  0x96   :  { %85 = vpow2.f32 %v25_v6 }
  0x99   :  { %v23_v9 = vpop.permute.xlu0 %22 }
  0x9a   :  { %vm24_vm1 = vcmp.eq.s32.totalorder %v20_v8, %v23_v9 }
  0x9b   :  { %v30_v12 = vsel %vm24_vm1, %v18_v5, 0.0 }
  0x9c   :  { %v31_v13 = vsel %vm14_vm0, %v30_v12, 0.0 }
  0xa0   :  { %v86_v10 = vpop.eup %85 }
  0xa1   :  { %v27_v11 = vsel %vm14_vm0, %v86_v10, 0.0 }
  0xa2   :  { %28 = vadd.xlane.f32.xlu1 %v27_v11 }
  0xa6   :  { %32 = vadd.xlane.f32.xlu1 %v31_v13 }
 0x12f   :  { %v29_v14 = vpop.xlane.xlu1 %28 }
 0x130   :  { %87 = vlog2.f32 %v29_v14 }
 0x133   :  { %v33_v17 = vpop.xlane.xlu1 %32 }
 0x13a   :  { %v88_v15 = vpop.eup %87 }
 0x13b   :  { %v35_v16 = vmul.f32 0.6931472, %v88_v15 }
 0x13d   :  { %v36_v18 = vsub.f32 %v33_v17, %v35_v16 }
 0x13f   :  { %v38_v19 = vmul.f32 1.442695, %v36_v18  ;;  %v37_v22 = vsub.f32 0.0, %v36_v18 }
 0x141   :  { %89 = vpow2.f32 %v38_v19 }
 0x14b   :  { %v90_v20 = vpop.eup %89 }
 0x14c   :  { %v40_v21 = vsub.f32 1.0, %v90_v20 }
 0x14e   :  { %v41_v23 = vmul.f32 %v40_v21, %v40_v21 }
 0x150   :  { %v42_v24 = vmul.f32 %v41_v23, %v37_v22 }
 0x152   :  { %v51_v25 = vsel %vm50_vm2, %v42_v24, 0.0 }
 0x153   :  { %52 = vadd.xlane.f32.xlu1 %v51_v25 }
 0x1e0   :  { %v53_v27 = vpop.xlane.xlu1 %52 }
 0x1e1   :  { %v54_v28 = vrot.slane %v53_v27, 4 }
 0x1e3   :  { %v55_v29 = vadd.f32 %v54_v28, %v53_v27 }
 0x1e5   :  { %v56_v30 = vrot.slane %v55_v29, 2 }
 0x1e7   :  { %v57_v31 = vadd.f32 %v56_v30, %v55_v29 }
 0x1e9   :  { %v58_v32 = vrot.slane %v57_v31, 1 }
 0x1eb   :  { %v59_v33 = vadd.f32 %v58_v32, %v57_v31 }
 0x1ed   :  { %79 = vpush %v59_v33 }
 0x21e   :  { %s80_s13 = spop %79 }
 0x21f   :  { %v61_v35 = vstv %s80_s13 }
 0x220   :  { %v62_v36 = vadd.f32 %v61_v35, %v49_v34 }
 0x222   :  { %64 = vst.msk [vmem:[#allocation2] sm:$0x1] %vm47_vm3, %v62_v36 }
 0x223   :  { %102 = shalt.err (!%p99_p4)
}
 0x224   :  { %s103_s18 = scalar_lea.hbm %s158_s2, 16 }
 0x225   :  { %p104_p5 = scmp.ne.s32.totalorder %s158_s2, %s103_s18  ;;  %p107_p6 = scmp.lt.u32.totalorder %s103_s18, %s158_s2 }
 0x227   :  { %p109_p7 = pnand %p107_p6, %p104_p5 }
 0x229   :  { %112 = shalt.err (!%p109_p7)
}
 0x22a   :  { %74 = dma.vmem_to_hbm [thread:$0]  %s72_s1, 16, %s158_s2, [#allocation3]  }
 0x22b   :  { %113 = dma.done.wait [#allocation3], 16  }
 0x22c   :  { %114 = vsyncadd [#allocation3], 4294967280 }
 0x22d   :  { %78 = vsyncpa [#allocation3], 1 }

</bundles_post_ra>
